<compile_context>
chip_gen: v7x
topology: tpu7x:2x2x1
jax: 0.10.0
libtpu: 0.0.40
codegen_flags: <defaults>
</compile_context>

<pallas_src>
import functools
import math

import jax
import jax.numpy as jnp
from jax.experimental import pallas as pl
from jax.experimental.pallas import tpu as pltpu


def _round_up(x, m):
    return ((x + m - 1) // m) * m


def _sublane_pack(dtype):
    # f32 vregs are (8, 128); sub-32-bit dtypes pack along sublanes
    # (bf16 -> 16 rows, int8/fp8 -> 32 rows per packed tile).
    return max(8, 32 // jnp.dtype(dtype).itemsize)


def _la_hardsilu_kernel(x_ref, o_ref, *, alpha, inv_d, inv_dm1):
    # x_ref / o_ref: (TB, D) tile resident in VMEM; one full sample per row.
    x = x_ref[...].astype(jnp.float32)

    # Per-sample stats over the lane axis only (the block covers all of D,
    # so every element seen is valid -- no mask needed).
    mean = jnp.sum(x, axis=-1, keepdims=True) * inv_d
    diff = x - mean
    var = jnp.sum(diff * diff, axis=-1, keepdims=True) * inv_dm1  # unbiased

    n = diff * jax.lax.rsqrt(var + alpha)

    # hard-sigmoid gate: clamp(n/6 + 0.5, 0, 1).  Identical to the nested
    # torch.where for finite n; NaN inputs propagate NaN instead of 1.
    s = jnp.minimum(jnp.maximum(n * (1.0 / 6.0) + 0.5, 0.0), 1.0)

    o_ref[...] = (x * s).astype(o_ref.dtype)


def _pick_batch_tile(b, d, dtype):
    """Rows per block: ~2 MiB input tiles, >=16 grid steps when B allows,
    rounded to the sublane-packing multiple for dense vregs / unmasked vst."""
    pack = _sublane_pack(dtype)
    if b <= pack:
        return b  # block dim == full array dim is always legal
    row_bytes = max(1, d * jnp.dtype(dtype).itemsize)
    tb_bytes = max(1, (2 << 20) // row_bytes)  # ~2 MiB tile target
    tb_steps = pl.cdiv(b, 16)                  # >=16 steps (pipeline + 2 TCs on v7x)
    tb = _round_up(max(pack, min(tb_bytes, tb_steps)), pack)
    return b if tb >= b else tb


def _vmem_limit_bytes(tb, d, itemsize):
    # double-buffered in/out tiles in native dtype + ~4 live f32 slabs of the
    # tile, plus headroom for compiler scratch; capped at 48 MiB (safe inside
    # v7x's 64 MiB per-TC VMEM, well above v5e's 16 MiB scoped default).
    need = tb * d * (4 * itemsize + 4 * 4) + (8 << 20)
    return int(min(max(need, 32 << 20), 48 << 20))


def la_hardsilu(x, alpha=1e-5):
    """x: (B, ...) float array. Returns z with the same shape/dtype."""
    orig_shape = x.shape
    b = orig_shape[0]
    d = int(math.prod(orig_shape[1:]))

    x2 = x.reshape(b, d)  # contiguous reshape: no extra HBM pass
    tb = _pick_batch_tile(b, d, x.dtype)
    nbt = pl.cdiv(b, tb)  # grid overhang handles B % tb != 0 (no batch pad)

    # d == 1: unbiased variance is 0/0 -> NaN, matching torch.var(correction=1).
    inv_dm1 = 1.0 / float(d - 1) if d > 1 else float("nan")
    kernel = functools.partial(
        _la_hardsilu_kernel,
        alpha=float(alpha),
        inv_d=1.0 / float(d),
        inv_dm1=inv_dm1,
    )

    out2 = pl.pallas_call(
        kernel,
        out_shape=jax.ShapeDtypeStruct((b, d), x.dtype),
        grid=(nbt,),
        in_specs=[pl.BlockSpec((tb, d), lambda i: (i, 0))],
        out_specs=pl.BlockSpec((tb, d), lambda i: (i, 0)),
        compiler_params=pltpu.CompilerParams(
            dimension_semantics=("parallel",),
            vmem_limit_bytes=_vmem_limit_bytes(tb, d, jnp.dtype(x.dtype).itemsize),
        ),
    )(x2)

    return out2.reshape(orig_shape)


def _la_hardsilu_ref(x, alpha=1e-5):
    """Pure-JAX reference mirroring the PyTorch forward."""
    b = x.shape[0]
    xf = x.reshape(b, -1).astype(jnp.float32)
    d = xf.shape[1]
    mean = jnp.mean(xf, axis=-1, keepdims=True)
    var = jnp.sum((xf - mean) ** 2, axis=-1, keepdims=True) / (d - 1)
    n = (xf - mean) / jnp.sqrt(var + alpha)
    s = jnp.where(n <= 3.0,
                  jnp.where(n <= -3.0, 0.0, n * (1.0 / 6.0) + 0.5),
                  1.0)
    return (xf * s).reshape(x.shape).astype(x.dtype)


if __name__ == "__main__":
    key = jax.random.PRNGKey(0)
    k1, k2, k3 = jax.random.split(key, 3)

    # Primary: small NCHW input, lane-aligned D = 4*16*16 = 1024, B < 8.
    x1 = jax.random.normal(k1, (2, 4, 16, 16), dtype=jnp.float32)
    z1 = jax.block_until_ready(la_hardsilu(x1, alpha=1e-5))
    assert z1.shape == x1.shape and z1.dtype == x1.dtype
    assert jnp.allclose(z1, _la_hardsilu_ref(x1, 1e-5), atol=1e-5, rtol=1e-5), \
        "mismatch vs reference (aligned)"

    # Non-128-aligned reduction size D = 3*5*7 = 105 (no pad, no mask needed).
    x2 = jax.random.normal(k2, (2, 3, 5, 7), dtype=jnp.float32)
    z2 = jax.block_until_ready(la_hardsilu(x2, alpha=1e-5))
    assert jnp.allclose(z2, _la_hardsilu_ref(x2, 1e-5), atol=1e-5, rtol=1e-5), \
        "mismatch vs reference (unaligned D)"

    # Batch not a multiple of the tile: exercises grid overhang on the last block.
    x3 = jax.random.normal(k3, (20, 4, 16, 16), dtype=jnp.float32)
    z3 = jax.block_until_ready(la_hardsilu(x3, alpha=1e-5))
    assert jnp.allclose(z3, _la_hardsilu_ref(x3, 1e-5), atol=1e-5, rtol=1e-5), \
        "mismatch vs reference (batch overhang)"

    # bf16 path: sublane packing of 16 rows + batch overhang.
    x4 = jax.random.normal(k3, (20, 3, 5, 7), dtype=jnp.bfloat16)
    z4 = jax.block_until_ready(la_hardsilu(x4, alpha=1e-5))
    assert jnp.allclose(z4.astype(jnp.float32),
                        _la_hardsilu_ref(x4, 1e-5).astype(jnp.float32),
                        atol=2e-2, rtol=2e-2), "mismatch vs reference (bf16)"

    print("KERNEL_OK")
</pallas_src>

<mosaic_0001>
module attributes {stable_mosaic.version = 11 : i64} {
  func.func @_la_hardsilu_kernel(%arg0: i32, %arg1: memref<2x1024xf32, #tpu.memory_space<vmem>>, %arg2: memref<2x1024xf32, #tpu.memory_space<vmem>>) attributes {dimension_semantics = [#tpu.dimension_semantics<parallel>], iteration_bounds = array<i64: 1>, scalar_prefetch = 0 : i64, scratch_operands = 0 : i64, tpu.core_type = #tpu.core_type<tc>, window_params = [{transform_indices = @transform_0, window_bounds = array<i64: 2, 1024>}, {transform_indices = @transform_1, window_bounds = array<i64: 2, 1024>}]} {
    %c0 = arith.constant 0 : index
    %c0_0 = arith.constant 0 : index
    %0 = vector.load %arg1[%c0, %c0_0] : memref<2x1024xf32, #tpu.memory_space<vmem>>, vector<2x1024xf32>
    %cst = arith.constant dense<0.000000e+00> : vector<2xf32>
    %1 = vector.multi_reduction <add>, %0, %cst [1] : vector<2x1024xf32> to vector<2xf32>
    %2 = vector.shape_cast %1 : vector<2xf32> to vector<2x1xf32>
    %cst_1 = arith.constant 9.765625E-4 : f32
    %3 = vector.broadcast %cst_1 : f32 to vector<2x1xf32>
    %4 = arith.mulf %2, %3 : vector<2x1xf32>
    %5 = vector.broadcast %4 : vector<2x1xf32> to vector<2x1024xf32>
    %6 = arith.subf %0, %5 : vector<2x1024xf32>
    %7 = arith.mulf %6, %6 : vector<2x1024xf32>
    %cst_2 = arith.constant dense<0.000000e+00> : vector<2xf32>
    %8 = vector.multi_reduction <add>, %7, %cst_2 [1] : vector<2x1024xf32> to vector<2xf32>
    %9 = vector.shape_cast %8 : vector<2xf32> to vector<2x1xf32>
    %cst_3 = arith.constant 9.77517105E-4 : f32
    %10 = vector.broadcast %cst_3 : f32 to vector<2x1xf32>
    %11 = arith.mulf %9, %10 : vector<2x1xf32>
    %cst_4 = arith.constant 9.99999974E-6 : f32
    %12 = vector.broadcast %cst_4 : f32 to vector<2x1xf32>
    %13 = arith.addf %11, %12 : vector<2x1xf32>
    %14 = math.rsqrt %13 : vector<2x1xf32>
    %15 = vector.broadcast %14 : vector<2x1xf32> to vector<2x1024xf32>
    %16 = arith.mulf %6, %15 : vector<2x1024xf32>
    %cst_5 = arith.constant 0.166666672 : f32
    %17 = vector.broadcast %cst_5 : f32 to vector<2x1024xf32>
    %18 = arith.mulf %16, %17 : vector<2x1024xf32>
    %cst_6 = arith.constant 5.000000e-01 : f32
    %19 = vector.broadcast %cst_6 : f32 to vector<2x1024xf32>
    %20 = arith.addf %18, %19 : vector<2x1024xf32>
    %cst_7 = arith.constant 0.000000e+00 : f32
    %21 = vector.broadcast %cst_7 : f32 to vector<2x1024xf32>
    %22 = arith.maximumf %20, %21 : vector<2x1024xf32>
    %cst_8 = arith.constant 1.000000e+00 : f32
    %23 = vector.broadcast %cst_8 : f32 to vector<2x1024xf32>
    %24 = arith.minimumf %22, %23 : vector<2x1024xf32>
    %25 = arith.mulf %0, %24 : vector<2x1024xf32>
    %c0_9 = arith.constant 0 : index
    %c0_10 = arith.constant 0 : index
    %26 = vector.load %arg2[%c0_9, %c0_10] : memref<2x1024xf32, #tpu.memory_space<vmem>>, vector<2x1024xf32>
    tpu.vector_store %arg2[%c0_9, %c0_10], %25 {strides = array<i32>} : memref<2x1024xf32, #tpu.memory_space<vmem>>, vector<2x1024xf32>,
    return
  }
  func.func @transform_0(%arg0: i32) -> (i32, i32) {
    %c0_i32 = arith.constant 0 : i32
    %c0_i32_0 = arith.constant 0 : i32
    return %arg0, %c0_i32 : i32, i32
  }
  func.func @transform_1(%arg0: i32) -> (i32, i32) {
    %c0_i32 = arith.constant 0 : i32
    %c0_i32_0 = arith.constant 0 : i32
    return %arg0, %c0_i32 : i32, i32
  }
}

</mosaic_0001>

<bundles_post_ra>
// kernel: tpu_custom_call.1
= control target key start
LH: loop header
LB: loop body
LE: loop exit
PB: predicated region body
PF: predicated region fallthrough
CT: control target
= control target key end

     0   :  { %6 = vsyncpa [#allocation3], 0  ;;  %s325_s0 = inlined_call_operand.hbm [shape: f32[2,1024], index: 0, kind: input, shape index: {}]   ;;  %s326_s1 = inlined_call_operand.hbm [shape: f32[2,1024], index: 1, kind: output, shape index: {}]  }
   0x1   :  { %7 = vsyncpa [#allocation4], 0  ;;  %s257_s6 = smov [#allocation2]   ;;  %s209_s10 = scalar_lea.hbm %s325_s0, 256 }
   0x2   :  { %s14_s7 = sshll.u32 %s257_s6, 4  ;;  %p210_p0 = scmp.ne.s32.totalorder %s325_s0, %s209_s10  ;;  %s15_s7 = int_to_ptr.vmem [resolvable:$true] %s14_s7 }
   0x3   :  { %p213_p1 = scmp.lt.u32.totalorder %s209_s10, %s325_s0 }
   0x5   :  { %p215_p2 = pnand %p213_p1, %p210_p0 }
   0x7   :  { %218 = shalt.err (!%p215_p2)
}
   0x8   :  { %s219_s15 = scalar_lea.vmem %s15_s7, 256  ;;  %p224_p4 = scmp.lt.s32.totalorder %s15_s7, %s15_s7 }
   0x9   :  { %p220_p3 = scmp.ne.s32.totalorder %s15_s7, %s219_s15  ;;  %p225_p5 = scmp.lt.s32.totalorder %s219_s15, %s219_s15 }
   0xb   :  { %p226_p6 = por %p225_p5, %p224_p4 }
   0xd   :  { %p227_p7 = pnand %p226_p6, %p220_p3 }
   0xf   :  { %230 = shalt.err (!%p227_p7)
}
  0x10   :  { %17 = dma.hbm_to_vmem [thread:$0]  %s325_s0, 256, %s15_s7, [#allocation3]  }
  0x11   :  { %253 = dma.done.wait [#allocation3], 256  }
  0x12   :  { %254 = vsyncadd [#allocation3], 4294967040  ;;  %v29_v0 = vlaneseq  ;;  %v258_v1 = vmov 1983009808   ;;  %v283_v6 = vld [vmem:[#allocation2] sm:$0xff]  ;;  %v285_v7 = vld [vmem:[#allocation2 + $0x8] sm:$0xff] }
  0x13   :  { %v27_v2 = vunpack.c.l.s4 %v258_v1  ;;  %v25_v8 = vcombine.high %v283_v6, %v283_v6  ;;  %vm67_vm0 = vcmask 1041408   ;;  %v42_v12 = vcombine.high %v285_v7, %v285_v7  ;;  %s260_s0 = smov [#allocation5]  }
  0x14   :  { %v30_v3 = vshrl.u32 %v29_v0, 7  ;;  %v259_v33 = vmov 269488144   ;;  %s192_s18 = sshll.u32 %s260_s0, 4  ;;  %s193_s18 = int_to_ptr.vmem [resolvable:$true] %s192_s18 }
  0x15   :  { %v28_v4 = vunpack.c.0.s8 %v27_v2  ;;  %v88_v34 = vunpack.c.l.s4 %v259_v33  ;;  %s231_s19 = scalar_lea.vmem %s193_s18, 256  ;;  %p236_p9 = scmp.lt.s32.totalorder %s193_s18, %s193_s18 }
  0x16   :  { %p232_p8 = scmp.ne.s32.totalorder %s193_s18, %s231_s19  ;;  %p237_p10 = scmp.lt.s32.totalorder %s231_s19, %s231_s19 }
  0x17   :  { %v31_v5 = vsub.s32 %v28_v4, %v30_v3  ;;  %v89_v35 = vunpack.c.0.s8 %v88_v34 }
  0x18   :  { %p238_p11 = por %p237_p10, %p236_p9 }
  0x19   :  { %v32_v9 = vrot.slane %v283_v6, %v31_v5  ;;  %v39_v10 = vrot.slane %v25_v8, %v31_v5  ;;  %v49_v13 = vrot.slane %v285_v7, %v31_v5  ;;  %v56_v19 = vrot.slane %v42_v12, %v31_v5 }
  0x1a   :  { %v92_v36 = vsub.s32 %v89_v35, %v30_v3  ;;  %p239_p12 = pnand %p238_p11, %p232_p8 }
  0x1b   :  { %v40_v11 = vcombine.high %v32_v9, %v32_v9  ;;  %v68_v14 = vsel %vm67_vm0, %v32_v9, 0.0  ;;  %v41_v15 = vcombine.high %v39_v10, %v39_v10  ;;  %v71_v17 = vsel %vm67_vm0, %v39_v10, 0.0 }
  0x1c   :  { %v57_v20 = vcombine.high %v49_v13, %v49_v13  ;;  %v75_v23 = vsel %vm67_vm0, %v49_v13, 0.0  ;;  %v58_v25 = vcombine.high %v56_v19, %v56_v19  ;;  %v79_v28 = vsel %vm67_vm0, %v56_v19, 0.0 }
  0x1d   :  { %v69_v16 = vsel %vm67_vm0, %v40_v11, 0.0  ;;  %v73_v21 = vsel %vm67_vm0, %v41_v15, 0.0 }
  0x1e   :  { %v70_v18 = vadd.f32 %v69_v16, %v68_v14  ;;  %v77_v26 = vsel %vm67_vm0, %v57_v20, 0.0  ;;  %v81_v30 = vsel %vm67_vm0, %v58_v25, 0.0 }
  0x20   :  { %v72_v22 = vadd.f32 %v71_v17, %v70_v18 }
  0x22   :  { %v74_v24 = vadd.f32 %v73_v21, %v72_v22 }
  0x24   :  { %v76_v27 = vadd.f32 %v75_v23, %v74_v24 }
  0x26   :  { %v78_v29 = vadd.f32 %v77_v26, %v76_v27 }
  0x28   :  { %v80_v31 = vadd.f32 %v79_v28, %v78_v29 }
  0x2a   :  { %v82_v32 = vadd.f32 %v81_v30, %v80_v31 }
  0x2c   :  { %83 = vadd.xlane.f32.xlu0 %v82_v32 }
  0xb9   :  { %v84_v37 = vpop.xlane.xlu0 %83 }
  0xba   :  { %v85_v38 = vmul.f32 0.0009765625, %v84_v37 }
  0xbc   :  { %v93_v39 = vrot.slane %v85_v38, %v92_v36 }
  0xbe   :  { %v95_v40 = vsub.f32 %v283_v6, %v93_v39  ;;  %v96_v41 = vsub.f32 %v285_v7, %v93_v39 }
  0xc0   :  { %v97_v42 = vmul.f32 %v95_v40, %v95_v40  ;;  %v98_v43 = vmul.f32 %v96_v41, %v96_v41 }
  0xc2   :  { %v101_v44 = vcombine.high %v97_v42, %v97_v42  ;;  %v108_v45 = vrot.slane %v97_v42, %v31_v5  ;;  %v125_v48 = vrot.slane %v98_v43, %v31_v5  ;;  %v118_v52 = vcombine.high %v98_v43, %v98_v43 }
  0xc4   :  { %v115_v46 = vrot.slane %v101_v44, %v31_v5  ;;  %v116_v47 = vcombine.high %v108_v45, %v108_v45  ;;  %v143_v49 = vsel %vm67_vm0, %v108_v45, 0.0  ;;  %v132_v56 = vrot.slane %v118_v52, %v31_v5 }
  0xc5   :  { %v133_v57 = vcombine.high %v125_v48, %v125_v48  ;;  %v150_v60 = vsel %vm67_vm0, %v125_v48, 0.0 }
  0xc6   :  { %v144_v50 = vsel %vm67_vm0, %v116_v47, 0.0  ;;  %v117_v51 = vcombine.high %v115_v46, %v115_v46  ;;  %v146_v54 = vsel %vm67_vm0, %v115_v46, 0.0  ;;  %v134_v62 = vcombine.high %v132_v56, %v132_v56 }
  0xc7   :  { %v145_v53 = vadd.f32 %v144_v50, %v143_v49  ;;  %v152_v63 = vsel %vm67_vm0, %v133_v57, 0.0  ;;  %v154_v1 = vsel %vm67_vm0, %v132_v56, 0.0 }
  0xc8   :  { %v148_v58 = vsel %vm67_vm0, %v117_v51, 0.0  ;;  %v156_v3 = vsel %vm67_vm0, %v134_v62, 0.0 }
  0xc9   :  { %v147_v55 = vadd.f32 %v146_v54, %v145_v53 }
  0xcb   :  { %v149_v59 = vadd.f32 %v148_v58, %v147_v55 }
  0xcd   :  { %v151_v61 = vadd.f32 %v150_v60, %v149_v59 }
  0xcf   :  { %v153_v0 = vadd.f32 %v152_v63, %v151_v61 }
  0xd1   :  { %v155_v2 = vadd.f32 %v154_v1, %v153_v0 }
  0xd3   :  { %v157_v4 = vadd.f32 %v156_v3, %v155_v2 }
  0xd5   :  { %158 = vadd.xlane.f32.xlu0 %v157_v4 }
 0x162   :  { %v159_v8 = vpop.xlane.xlu0 %158 }
 0x163   :  { %v160_v5 = vmul.f32 0.0009775171, %v159_v8 }
 0x165   :  { %v161_v9 = vadd.f32 1e-05, %v160_v5 }
 0x167   :  { %207 = vrsqrt.f32 %v161_v9 }
 0x171   :  { %v208_v10 = vpop.eup %207 }
 0x172   :  { %v170_v11 = vrot.slane %v208_v10, %v92_v36 }
 0x174   :  { %v172_v12 = vmul.f32 %v170_v11, %v95_v40  ;;  %v173_v13 = vmul.f32 %v170_v11, %v96_v41 }
 0x176   :  { %v174_v14 = vmul.f32 0.16666667, %v172_v12  ;;  %v175_v15 = vmul.f32 0.16666667, %v173_v13 }
 0x178   :  { %v176_v16 = vadd.f32 0.5, %v174_v14  ;;  %v177_v17 = vadd.f32 0.5, %v175_v15 }
 0x17a   :  { %v178_v18 = vmax.f32 %v176_v16, 0.0  ;;  %v179_v19 = vmax.f32 %v177_v17, 0.0 }
 0x17c   :  { %v180_v20 = vmin.f32 %v178_v18, 1.0  ;;  %v181_v21 = vmin.f32 %v179_v19, 1.0 }
 0x17e   :  { %v182_v22 = vmul.f32 %v180_v20, %v283_v6  ;;  %v183_v23 = vmul.f32 %v181_v21, %v285_v7 }
 0x180   :  { %184 = vst [vmem:[#allocation5] sm:$0xff] %v182_v22  ;;  %185 = vst [vmem:[#allocation5 + $0x8] sm:$0xff] %v183_v23 }
 0x181   :  { %242 = shalt.err (!%p239_p12)
}
 0x182   :  { %s243_s22 = scalar_lea.hbm %s326_s1, 256 }
 0x183   :  { %p244_p13 = scmp.ne.s32.totalorder %s326_s1, %s243_s22  ;;  %p247_p0 = scmp.lt.u32.totalorder %s243_s22, %s326_s1 }
 0x185   :  { %p249_p1 = pnand %p247_p0, %p244_p13 }
 0x187   :  { %252 = shalt.err (!%p249_p1)
}
 0x188   :  { %195 = dma.vmem_to_hbm [thread:$0]  %s193_s18, 256, %s326_s1, [#allocation4]  }
 0x189   :  { %255 = dma.done.wait [#allocation4], 256  }
 0x18a   :  { %256 = vsyncadd [#allocation4], 4294967040 }
 0x18b   :  { %199 = vsyncpa [#allocation3], 1 }
 0x18c   :  { %200 = vsyncpa [#allocation4], 1 }

</bundles_post_ra>
